<compile_context>
chip_gen: v7x
topology: tpu7x:2x2x1
jax: 0.10.0
libtpu: 0.0.40
codegen_flags: <defaults>
</compile_context>

<pallas_src>
import jax
import jax.numpy as jnp
from jax.experimental import pallas as pl
from jax.experimental.pallas import tpu as pltpu


def _convres_kernel(x_ref, w1_ref, b1_ref, w2_ref, b2_ref, o_ref):
    # x_ref:  (BB, C, TN)  channels-first tiles (lane axis = N), io_dtype
    # w1_ref: (MID, C)     BN-folded weight of net1 (conv1x1 + BN1), f32
    # b1_ref: (MID, 1)     BN-folded bias of net1 (broadcasts along lanes)
    # w2_ref: (C, MID)     BN-folded weight of net2
    # b2_ref: (C, 1)       BN-folded bias of net2
    # o_ref:  (BB, C, TN)
    w1 = w1_ref[...]
    w2 = w2_ref[...]
    b1 = b1_ref[...]
    b2 = b2_ref[...]
    bb = x_ref.shape[0]                      # small compile-time constant
    for b in range(bb):                      # static unroll over batch block
        x = x_ref[b].astype(jnp.float32)     # (C, TN) f32 compute
        h = jnp.dot(w1, x, preferred_element_type=jnp.float32)
        h = jnp.maximum(h + b1, 0.0)                         # net1 ReLU
        y = jnp.dot(w2, h, preferred_element_type=jnp.float32)
        y = y + b2                                           # net2 (no act)
        o_ref[b] = jnp.maximum(y + x, 0.0).astype(o_ref.dtype)   # residual ReLU


def _pick_tiles(B, N, C, itemsize, *, target_bytes=2 << 20, max_tn=16384,
                min_steps=2):
    """Choose (bb, tn). Assumes N % 128 == 0 (wrapper pads)."""
    # tn: largest multiple of 128 dividing N, capped at max_tn.
    cap = min(N, max_tn)
    tn = 128
    d = cap - (cap % 128)
    while d >= 128:
        if N % d == 0:
            tn = d
            break
        d -= 128
    # bb: block batches until each tile carries ~target_bytes of payload.
    tile_bytes = C * tn * itemsize
    want_bb = max(1, target_bytes // max(tile_bytes, 1))
    bb = 1
    for cand in range(min(B, int(want_bb)), 0, -1):
        if B % cand == 0:
            bb = cand
            break

    def steps(bb_, tn_):
        return (B // bb_) * (N // tn_)

    # v7x megacore: keep >= min_steps grid steps (shrink bb first, then tn).
    while steps(bb, tn) < min_steps and bb > 1:
        nb = bb - 1
        while nb > 1 and B % nb != 0:
            nb -= 1
        bb = nb
    while steps(bb, tn) < min_steps and tn > 128:
        nt = tn - 128
        while nt > 128 and N % nt != 0:
            nt -= 128
        if N % nt != 0:
            break
        tn = nt
    return bb, tn


def conv_res_module(x_ncl, w1, b1, w2, b2, *, tn=None, bb=None,
                    io_dtype=jnp.bfloat16):
    """x_ncl: (B, C, N) (PyTorch Conv1d NCL layout). Returns (B, C, N).

    w1: (MID, C), b1: (MID, 1), w2: (C, MID), b2: (C, 1) -- BN-folded params.
    Streaming I/O is cast to io_dtype (default bf16); compute stays f32.
    """
    B, C, N = x_ncl.shape
    MID = w1.shape[0]

    w1 = w1.astype(jnp.float32)
    w2 = w2.astype(jnp.float32)
    b1 = b1.reshape(MID, 1).astype(jnp.float32)
    b2 = b2.reshape(C, 1).astype(jnp.float32)

    # Pad N to a multiple of 128 so stores stay full-width unmasked vst.
    n_pad = ((N + 127) // 128) * 128
    x_in = x_ncl
    if n_pad != N:
        x_in = jnp.pad(x_ncl, ((0, 0), (0, 0), (0, n_pad - N)))
    x_in = x_in.astype(io_dtype)

    bb_auto, tn_auto = _pick_tiles(B, n_pad, C, jnp.dtype(io_dtype).itemsize)
    if tn is None:
        tn = tn_auto
    if bb is None:
        bb = bb_auto
    assert n_pad % tn == 0 and tn % 128 == 0, "N tile must be lane-aligned"
    assert B % bb == 0, "batch tile must divide B"

    out = pl.pallas_call(
        _convres_kernel,
        out_shape=jax.ShapeDtypeStruct((B, C, n_pad), io_dtype),
        grid_spec=pltpu.PrefetchScalarGridSpec(
            num_scalar_prefetch=0,
            grid=(B // bb, n_pad // tn),
            in_specs=[
                # (batch_block, channel_block, n_block) = (ib, 0, ni)
                pl.BlockSpec((bb, C, tn), lambda ib, ni: (ib, 0, ni)),
                pl.BlockSpec((MID, C),    lambda ib, ni: (0, 0)),
                pl.BlockSpec((MID, 1),    lambda ib, ni: (0, 0)),
                pl.BlockSpec((C, MID),    lambda ib, ni: (0, 0)),
                pl.BlockSpec((C, 1),      lambda ib, ni: (0, 0)),
            ],
            out_specs=pl.BlockSpec((bb, C, tn), lambda ib, ni: (ib, 0, ni)),
        ),
        compiler_params=pltpu.CompilerParams(
            dimension_semantics=("parallel", "parallel"),
            vmem_limit_bytes=48 << 20),
    )(x_in, w1, b1, w2, b2)

    if n_pad != N:
        out = out[:, :, :N]
    return out


def _fold_conv_bn(conv_w, gamma, beta, mean, var, eps=1e-5):
    """conv_w: (OUT, IN) 1x1 conv weight (no conv bias — ConvModule default).

    Returns (w_eff: (OUT, IN), b_eff: (OUT, 1)) so that
        W_eff @ x + b_eff == BN(conv(x))   in channels-first form.
    """
    scale = gamma / jnp.sqrt(var + eps)                       # (OUT,)
    w_eff = conv_w * scale[:, None]                           # (OUT, IN)
    b_eff = (beta - mean * scale)[:, None]                    # (OUT, 1)
    return w_eff.astype(jnp.float32), b_eff.astype(jnp.float32)


def _reference(x_ncl, w1, b1, w2, b2):
    h = jnp.maximum(jnp.einsum('oc,bcn->bon', w1, x_ncl) + b1[None], 0.0)
    y = jnp.einsum('co,bon->bcn', w2, h) + b2[None]
    return jnp.maximum(y + x_ncl, 0.0)


if __name__ == "__main__":
    # Shapes consistent with the module: Conv1d over (B, C, N), res_expansion=1
    B, C, N = 2, 32, 256
    MID = int(C * 1.0)

    key = jax.random.PRNGKey(0)
    kx, kx2, kx3, k1, k2, kg1, kb1, km1, kv1, kg2, kb2, km2, kv2 = \
        jax.random.split(key, 13)

    x = jax.random.normal(kx, (B, C, N), dtype=jnp.float32)

    # net1: Conv1d(C -> MID, k=1, bias=False) + BN1d(MID) + ReLU
    conv1_w = jax.random.normal(k1, (MID, C), dtype=jnp.float32) * 0.1
    bn1_gamma = 1.0 + 0.1 * jax.random.normal(kg1, (MID,), dtype=jnp.float32)
    bn1_beta = 0.1 * jax.random.normal(kb1, (MID,), dtype=jnp.float32)
    bn1_mean = 0.05 * jax.random.normal(km1, (MID,), dtype=jnp.float32)
    bn1_var = 1.0 + 0.1 * jnp.abs(jax.random.normal(kv1, (MID,), jnp.float32))

    # net2: Conv1d(MID -> C, k=1, bias=False) + BN1d(C), no activation
    conv2_w = jax.random.normal(k2, (C, MID), dtype=jnp.float32) * 0.1
    bn2_gamma = 1.0 + 0.1 * jax.random.normal(kg2, (C,), dtype=jnp.float32)
    bn2_beta = 0.1 * jax.random.normal(kb2, (C,), dtype=jnp.float32)
    bn2_mean = 0.05 * jax.random.normal(km2, (C,), dtype=jnp.float32)
    bn2_var = 1.0 + 0.1 * jnp.abs(jax.random.normal(kv2, (C,), jnp.float32))

    # Fold conv + BN (inference form) into effective channels-first matmuls.
    w1, b1 = _fold_conv_bn(conv1_w, bn1_gamma, bn1_beta, bn1_mean, bn1_var)
    w2, b2 = _fold_conv_bn(conv2_w, bn2_gamma, bn2_beta, bn2_mean, bn2_var)

    # --- Test 1: default (bf16 streaming I/O, auto tiles) -------------------
    ref = _reference(x, w1, b1, w2, b2)
    out_bf16 = conv_res_module(x, w1, b1, w2, b2)           # io_dtype=bf16
    jax.block_until_ready(out_bf16)
    assert out_bf16.shape == (B, C, N)
    assert jnp.allclose(out_bf16.astype(jnp.float32), ref, atol=5e-2, rtol=5e-2), \
        "bf16-I/O mismatch vs reference"

    # --- Test 2: f32 I/O, tight tolerance -----------------------------------
    out_f32 = conv_res_module(x, w1, b1, w2, b2, io_dtype=jnp.float32)
    jax.block_until_ready(out_f32)
    assert jnp.allclose(out_f32, ref, atol=1e-4, rtol=1e-4), \
        "f32-I/O mismatch vs reference"

    # --- Test 3: multi-N-tile + batch-blocked path (exercises fixed index_map)
    N2 = 512
    x2 = jax.random.normal(kx2, (B, C, N2), dtype=jnp.float32)
    ref2 = _reference(x2, w1, b1, w2, b2)
    out2 = conv_res_module(x2, w1, b1, w2, b2, tn=128, bb=2,
                           io_dtype=jnp.float32)
    jax.block_until_ready(out2)
    assert jnp.allclose(out2, ref2, atol=1e-4, rtol=1e-4), \
        "multi-tile mismatch vs reference"

    # --- Test 4: ragged N (pad-to-128 path) ----------------------------------
    N3 = 200
    x3 = jax.random.normal(kx3, (B, C, N3), dtype=jnp.float32)
    ref3 = _reference(x3, w1, b1, w2, b2)
    out3 = conv_res_module(x3, w1, b1, w2, b2, io_dtype=jnp.float32)
    jax.block_until_ready(out3)
    assert out3.shape == (B, C, N3)
    assert jnp.allclose(out3, ref3, atol=1e-4, rtol=1e-4), \
        "padded-N mismatch vs reference"

    print("KERNEL_OK")
</pallas_src>

<mosaic_0001>
module attributes {stable_mosaic.version = 11 : i64} {
  func.func @_convres_kernel(%arg0: i32, %arg1: i32, %arg2: memref<1x32x256xbf16, #tpu.memory_space<vmem>>, %arg3: memref<32x32xf32, #tpu.memory_space<vmem>>, %arg4: memref<32x1xf32, #tpu.memory_space<vmem>>, %arg5: memref<32x32xf32, #tpu.memory_space<vmem>>, %arg6: memref<32x1xf32, #tpu.memory_space<vmem>>, %arg7: memref<1x32x256xbf16, #tpu.memory_space<vmem>>) attributes {dimension_semantics = [#tpu.dimension_semantics<parallel>, #tpu.dimension_semantics<parallel>], iteration_bounds = array<i64: 2, 1>, scalar_prefetch = 0 : i64, scratch_operands = 0 : i64, tpu.core_type = #tpu.core_type<tc>, window_params = [{transform_indices = @transform_0, window_bounds = array<i64: 1, 32, 256>}, {pipeline_mode = #tpu.pipeline_mode<synchronous>, transform_indices = @transform_1, window_bounds = array<i64: 32, 32>}, {pipeline_mode = #tpu.pipeline_mode<synchronous>, transform_indices = @transform_2, window_bounds = array<i64: 32, 1>}, {pipeline_mode = #tpu.pipeline_mode<synchronous>, transform_indices = @transform_3, window_bounds = array<i64: 32, 32>}, {pipeline_mode = #tpu.pipeline_mode<synchronous>, transform_indices = @transform_4, window_bounds = array<i64: 32, 1>}, {transform_indices = @transform_5, window_bounds = array<i64: 1, 32, 256>}]} {
    %c0 = arith.constant 0 : index
    %c0_0 = arith.constant 0 : index
    %0 = vector.load %arg3[%c0, %c0_0] : memref<32x32xf32, #tpu.memory_space<vmem>>, vector<32x32xf32>
    %c0_1 = arith.constant 0 : index
    %c0_2 = arith.constant 0 : index
    %1 = vector.load %arg5[%c0_1, %c0_2] : memref<32x32xf32, #tpu.memory_space<vmem>>, vector<32x32xf32>
    %c0_3 = arith.constant 0 : index
    %c0_4 = arith.constant 0 : index
    %2 = vector.load %arg4[%c0_3, %c0_4] : memref<32x1xf32, #tpu.memory_space<vmem>>, vector<32x1xf32>
    %c0_5 = arith.constant 0 : index
    %c0_6 = arith.constant 0 : index
    %3 = vector.load %arg6[%c0_5, %c0_6] : memref<32x1xf32, #tpu.memory_space<vmem>>, vector<32x1xf32>
    %c0_7 = arith.constant 0 : index
    %c0_8 = arith.constant 0 : index
    %c0_9 = arith.constant 0 : index
    %4 = vector.load %arg2[%c0_7, %c0_8, %c0_9] : memref<1x32x256xbf16, #tpu.memory_space<vmem>>, vector<1x32x256xbf16>
    %5 = vector.shape_cast %4 : vector<1x32x256xbf16> to vector<32x256xbf16>
    %6 = arith.extf %5 : vector<32x256xbf16> to vector<32x256xf32>
    %cst = arith.constant dense<0.000000e+00> : vector<32x256xf32>
    %7 = tpu.matmul %0, %6, %cst {dimension_numbers = #tpu.dot_dimension_numbers<[1], [0], [0], [1], [0, 0, 1, 1], [], []>} : vector<32x32xf32>, vector<32x256xf32>, vector<32x256xf32> -> vector<32x256xf32>
    %8 = vector.broadcast %2 : vector<32x1xf32> to vector<32x256xf32>
    %9 = arith.addf %7, %8 : vector<32x256xf32>
    %cst_10 = arith.constant 0.000000e+00 : f32
    %10 = vector.broadcast %cst_10 : f32 to vector<32x256xf32>
    %11 = arith.maximumf %9, %10 : vector<32x256xf32>
    %cst_11 = arith.constant dense<0.000000e+00> : vector<32x256xf32>
    %12 = tpu.matmul %1, %11, %cst_11 {dimension_numbers = #tpu.dot_dimension_numbers<[1], [0], [0], [1], [0, 0, 1, 1], [], []>} : vector<32x32xf32>, vector<32x256xf32>, vector<32x256xf32> -> vector<32x256xf32>
    %13 = vector.broadcast %3 : vector<32x1xf32> to vector<32x256xf32>
    %14 = arith.addf %12, %13 : vector<32x256xf32>
    %15 = arith.addf %14, %6 : vector<32x256xf32>
    %cst_12 = arith.constant 0.000000e+00 : f32
    %16 = vector.broadcast %cst_12 : f32 to vector<32x256xf32>
    %17 = arith.maximumf %15, %16 : vector<32x256xf32>
    %18 = arith.truncf %17 : vector<32x256xf32> to vector<32x256xbf16>
    %c0_13 = arith.constant 0 : index
    %c0_14 = arith.constant 0 : index
    %c0_15 = arith.constant 0 : index
    %19 = vector.load %arg7[%c0_13, %c0_14, %c0_15] : memref<1x32x256xbf16, #tpu.memory_space<vmem>>, vector<1x32x256xbf16>
    %20 = vector.shape_cast %19 : vector<1x32x256xbf16> to vector<32x256xbf16>
    %21 = vector.shape_cast %18 : vector<32x256xbf16> to vector<1x32x256xbf16>
    tpu.vector_store %arg7[%c0_13, %c0_14, %c0_15], %21 {strides = array<i32>} : memref<1x32x256xbf16, #tpu.memory_space<vmem>>, vector<1x32x256xbf16>,
    return
  }
  func.func @transform_0(%arg0: i32, %arg1: i32) -> (i32, i32, i32) {
    %c0_i32 = arith.constant 0 : i32
    %c0_i32_0 = arith.constant 0 : i32
    return %arg0, %c0_i32, %arg1 : i32, i32, i32
  }
  func.func @transform_1(%arg0: i32, %arg1: i32) -> (i32, i32) {
    %c0_i32 = arith.constant 0 : i32
    %c0_i32_0 = arith.constant 0 : i32
    %c0_i32_1 = arith.constant 0 : i32
    return %c0_i32, %c0_i32_0 : i32, i32
  }
  func.func @transform_2(%arg0: i32, %arg1: i32) -> (i32, i32) {
    %c0_i32 = arith.constant 0 : i32
    %c0_i32_0 = arith.constant 0 : i32
    %c0_i32_1 = arith.constant 0 : i32
    return %c0_i32, %c0_i32_0 : i32, i32
  }
  func.func @transform_3(%arg0: i32, %arg1: i32) -> (i32, i32) {
    %c0_i32 = arith.constant 0 : i32
    %c0_i32_0 = arith.constant 0 : i32
    %c0_i32_1 = arith.constant 0 : i32
    return %c0_i32, %c0_i32_0 : i32, i32
  }
  func.func @transform_4(%arg0: i32, %arg1: i32) -> (i32, i32) {
    %c0_i32 = arith.constant 0 : i32
    %c0_i32_0 = arith.constant 0 : i32
    %c0_i32_1 = arith.constant 0 : i32
    return %c0_i32, %c0_i32_0 : i32, i32
  }
  func.func @transform_5(%arg0: i32, %arg1: i32) -> (i32, i32, i32) {
    %c0_i32 = arith.constant 0 : i32
    %c0_i32_0 = arith.constant 0 : i32
    return %arg0, %c0_i32, %arg1 : i32, i32, i32
  }
}

</mosaic_0001>

<bundles_post_ra>
// kernel: tpu_custom_call.1
= control target key start
LH: loop header
LB: loop body
LE: loop exit
PB: predicated region body
PF: predicated region fallthrough
CT: control target
= control target key end

     0   :  { %10 = vsyncpa [#allocation3], 0  ;;  %s1308_s0 = inlined_call_operand.vmem [shape: bf16[2,32,256], index: 0, kind: input, shape index: {}]   ;;  %s1309_s1 = inlined_call_operand.hbm [shape: f32[32,32], index: 1, kind: input, shape index: {}]   ;;  %s1310_s2 = inlined_call_operand.vmem [shape: f32[32,1], index: 2, kind: input, shape index: {}]   ;;  %s1311_s3 = inlined_call_operand.hbm [shape: f32[32,32], index: 3, kind: input, shape index: {}]   ;;  %s1312_s4 = inlined_call_operand.vmem [shape: f32[32,1], index: 4, kind: input, shape index: {}]   ;;  %s1313_s5 = inlined_call_operand.hbm [shape: bf16[2,32,256], index: 5, kind: output, shape index: {}]  }
   0x1   :  { %11 = vsyncpa [#allocation6], 0 }
   0x2   :  { %12 = vsyncpa [#allocation4], 0 }
   0x3   :  { %14 = vsyncpa [#allocation4 + $0x1], 0  ;;  %s1050_s18 = smov 0   ;;  %s1052_s19 = smov 0  }
   0x4   :  { %s1054_s20 = smov 0   ;;  %s1056_s21 = smov 0  }
   0x5   :  { %s1058_s22 = smov 0   ;;  %s1060_s23 = smov 0  }
   0x6 LB: > { %s724_s24 = sadd.s32 4294967295, %s1009_s23   ;;  %s725_s25 = sadd.s32 4294967294, %s1009_s23   ;;  %s1009_s23 = sphi %s1060_s23, %s20_s23   ;;  %s1005_s22 = sphi %s1058_s22, %s1334_s22   ;;  %s1001_s21 = sphi %s1056_s21, %s1333_s21   ;;  %s997_s20 = sphi %s1054_s20, %s1332_s20   ;;  %s993_s19 = sphi %s1052_s19, %s1331_s19   ;;  %s989_s18 = sphi %s1050_s18, %s1330_s18  }
   0x7   : > { %s32_s26 = sadd.s32 1, %s1005_s22  ;;  %s153_s27 = sadd.s32 1, %s997_s20 }
   0x8   : > { %p34_p0 = scmp.ge.s32.totalorder %s32_s26, 2  ;;  %p163_p1 = scmp.ne.s32.totalorder %s997_s20, %s993_s19 }
   0x9   : > { %p164_p2 = scmp.eq.s32.totalorder %s724_s24, 1  ;;  %p169_p3 = scmp.ne.s32.totalorder %s993_s19, %s989_s18 }
   0xa   : > { %s1336_s26 = smov (%p34_p0, %s32_s26), 0  ;;  %p170_p5 = scmp.eq.s32.totalorder %s725_s25, 1 }
   0xb   : > { %1319 = sst [smem:[#allocation11_spill]] %s1336_s26  ;;  %p1090_p4 = por %p164_p2, %p163_p1 }
   0xc   : > { %s148_s29 = ssub.s32 %s1005_s22, %s1336_s26  ;;  %p726_p6 = scmp.ge.s32.totalorder %s1009_s23, 1 }
   0xd   : > { %s1320_s28 = scalar_select %p1090_p4, 1, 0 }
   0xe   : > { %p151_p7 = scmp.eq.s32.totalorder %s148_s29, 0  ;;  %p1097_p8 = por %p170_p5, %p169_p3 }
   0xf   : > { %p177_p9 = scmp.lt.s32.totalorder %s1009_s23, 3  ;;  %p1109_p11 = scmp.eq.s32.totalorder %s724_s24, 0 }
  0x10   : > { %s1321_s30 = scalar_select %p1097_p8, 1, 0 }
  0x11   : > { %s1103_s6 = scalar_select %p151_p7, %s997_s20, %s153_s27  }
  0x12   : > { %p1105_p10 = pnand %p726_p6, %p177_p9  ;;  %s1011_s9 = smov [#allocation2]  }
  0x13   : > { %s1323_s8 = scalar_select %p1109_p11, 1, 0 }
  0x14   : > { %s1322_s7 = scalar_select %p1105_p10, 1, 0 }
  0x15   : > { %p789_p12 = pneg %p1105_p10  ;;  %s189_s10 = sshll.u32 %s1011_s9, 4  ;;  %s190_s10 = int_to_ptr.vmem [resolvable:$true] %s189_s10 }
  0x16   : > { %s1012_s12 = smov [#allocation5]   ;;  %s867_s16 = scalar_lea.hbm %s1309_s1, 512 }
  0x17   : > { %p1117_p13 = pnand %p1109_p11, %p789_p12  ;;  %s205_s13 = sshll.u32 %s1012_s12, 4  ;;  %s1121_s13 = int_to_ptr.vmem [resolvable:$true] %s205_s13 }
  0x18   : > { %p868_p0 = scmp.ne.s32.totalorder %s1309_s1, %s867_s16  ;;  %p874_p5 = scmp.lt.u32.totalorder %s867_s16, %s1309_s1 }
  0x19   : > { %p869_p1 = pneg %p1117_p13 }
  0x1b   : > { %p870_p2 = pnand %p869_p1, %p868_p0 }
  0x1d   : > { %p871_p3 = pneg %p870_p2 }
  0x1f   : > { %p876_p6 = pnand %p874_p5, %p871_p3 }
  0x21   : > { %879 = shalt.err (!%p876_p6)
}
  0x22   : > { %s880_s29 = scalar_lea.vmem %s190_s10, 512  ;;  %p888_p8 = scmp.lt.s32.totalorder %s190_s10, %s190_s10 }
  0x23   : > { %p881_p7 = scmp.ne.s32.totalorder %s190_s10, %s880_s29  ;;  %p889_p4 = scmp.lt.s32.totalorder %s880_s29, %s880_s29 }
  0x25   : > { %p883_p9 = pnand %p881_p7, %p869_p1  ;;  %p890_p11 = por %p889_p4, %p888_p8 }
  0x27   : > { %p884_p12 = pneg %p883_p9 }
  0x29   : > { %p891_p10 = pnand %p890_p11, %p884_p12 }
  0x2b   : > { %894 = shalt.err (!%p891_p10)
}
  0x2c   : > { %s1013_s9 = smov 128   ;;  %s1014_s12 = smov 8  }
  0x2d   : > { %792 = dma.hbm_to_vmem [thread:$0]  (!%p1117_p13), %s1309_s1, 512, %s190_s10, [#allocation3], %s1013_s9, %s1013_s9, %s1014_s12  }
  0x2e   : > { %s895_s24 = scalar_lea.hbm %s1311_s3, 512 }
  0x2f   : > { %p896_p0 = scmp.ne.s32.totalorder %s1311_s3, %s895_s24  ;;  %p902_p10 = scmp.lt.u32.totalorder %s895_s24, %s1311_s3 }
  0x31   : > { %p898_p4 = pnand %p896_p0, %p869_p1 }
  0x33   : > { %p899_p8 = pneg %p898_p4 }
  0x35   : > { %p904_p11 = pnand %p902_p10, %p899_p8 }
  0x37   : > { %907 = shalt.err (!%p904_p11)
}
  0x38   : > { %s908_s10 = scalar_lea.vmem %s1121_s13, 512  ;;  %p916_p6 = scmp.lt.s32.totalorder %s1121_s13, %s1121_s13 }
  0x39   : > { %p909_p2 = scmp.ne.s32.totalorder %s1121_s13, %s908_s10  ;;  %p917_p7 = scmp.lt.s32.totalorder %s908_s10, %s908_s10 }
  0x3b   : > { %p911_p3 = pnand %p909_p2, %p869_p1  ;;  %p918_p9 = por %p917_p7, %p916_p6 }
  0x3d   : > { %p912_p5 = pneg %p911_p3 }
  0x3f   : > { %p919_p12 = pnand %p918_p9, %p912_p5 }
  0x41   : > { %922 = shalt.err (!%p919_p12)
}
  0x42   : > { %795 = dma.hbm_to_vmem [thread:$0]  (!%p1117_p13), %s1311_s3, 512, %s1121_s13, [#allocation6], %s1013_s9, %s1013_s9, %s1014_s12  }
  0x43   : > { %p1325_p0 = scmp.ne.s32.totalorder %s1322_s7, 0 }
  0x44   : > { %p1326_p4 = scmp.ne.s32.totalorder (!%p1325_p0), %s1323_s8, 0 }
  0x45   : > { %237 = sbr.rel (%p1325_p0) target bundleno = 579 (0x243), region = 40 }
  0x4c   : > { %976 = dma.done.wait (%p1326_p4), [#allocation3], 512  }
  0x4d   : > { %978 = vsyncadd (%p1326_p4), [#allocation3], 4294966784 }
  0x4e   : > { %980 = dma.done.wait (%p1326_p4), [#allocation6], 512  }
  0x4f   : > { %982 = vsyncadd (%p1326_p4), [#allocation6], 4294966784  ;;  %p274_p1 = scmp.lt.s32.totalorder %s1001_s21, 1  ;;  %v1015_v0 = vmov 0.0   ;;  %v1016_v1 = vmov 0   ;;  %v292_v9 = vld [vmem:[%s1310_s2] sm:$0xff] }
  0x50   : > { %409 = vmatprep.mubr.f32.mxu0 %v1015_v0  ;;  %861 = vset.pattern.permute.xlu0 %v1016_v1  ;;  %v294_v10 = vld [vmem:[%s1310_s2 + $0x10] sm:$0xff]  ;;  %v293_v12 = vld [vmem:[%s1310_s2 + $0x8] sm:$0xff]  ;;  %v295_v13 = vld [vmem:[%s1310_s2 + $0x18] sm:$0xff]  ;;  %vm332_vm0 = vcmask 261120   ;;  %s270_s8 = sand.u32 1, %s993_s19   ;;  %s758_s24 = sshll.u32 %s1001_s21, 9 }
  0x51   : > { %s275_s7 = scalar_select %p274_p1, %s1001_s21, 1  ;;  %862 = vset.pattern.permute.xlu1 %v1016_v1  ;;  %538 = vmatprep.mubr.f32.mxu1 %v1015_v0  ;;  %v284_v14 = vld [vmem:[#allocation2] sm:$0xff]  ;;  %v297_v16 = vld [vmem:[%s1312_s4 + $0x8] sm:$0xff]  ;;  %v298_v18 = vld [vmem:[%s1312_s4 + $0x10] sm:$0xff] }
  0x52   : > { %314 = vperm.xlu0 %861, %v292_v9   ;;  %324 = vperm.xlu1 %862, %v294_v10   ;;  %v296_v15 = vld [vmem:[%s1312_s4] sm:$0xff]  ;;  %v285_v17 = vld [vmem:[#allocation2 + $0x8] sm:$0xff]  ;;  %v299_v19 = vld [vmem:[%s1312_s4 + $0x18] sm:$0xff]  ;;  %s733_s15 = sshll.u32 %s270_s8, 5  ;;  %s1258_s29 = scalar_lea.hbm %s1313_s5, %s758_s24 }
  0x53   : > { %s753_s11 = sshll.u32 %s275_s7, 5  ;;  %v286_v20 = vld [vmem:[#allocation2 + $0x10] sm:$0xff]  ;;  %v287_v21 = vld [vmem:[#allocation2 + $0x18] sm:$0xff]  ;;  %v288_v54 = vld [vmem:[#allocation5] sm:$0xff]  ;;  %s272_s16 = scalar_lea.vmem [#allocation7], %s733_s15 }
  0x54   : > { %s281_s12 = scalar_lea.vmem %s1308_s0, %s753_s11  ;;  %v289_v55 = vld [vmem:[#allocation5 + $0x8] sm:$0xff]  ;;  %v290_v56 = vld [vmem:[#allocation5 + $0x10] sm:$0xff]  ;;  %v291_v57 = vld [vmem:[#allocation5 + $0x18] sm:$0xff]  ;;  %s623_s17 = sshll.u32 %s272_s16, 4  ;;  %s1253_s17 = int_to_ptr.vmem [resolvable:$true] %s623_s17 }
  0x55   : > { %v1187_v2 = vld [vmem:[%s281_s12] sm:$0xff]  ;;  %v1189_v3 = vld [vmem:[%s281_s12 + $0x8] sm:$0xff]  ;;  %v1191_v4 = vld [vmem:[%s281_s12 + $0x10] sm:$0xff]  ;;  %s1262_s10 = scalar_lea.sflag [#allocation4], %s270_s8  ;;  %s923_s26 = scalar_lea.vmem %s1253_s17, 512 }
  0x56   : > { %v775_v5 = vcombine.high %v1187_v2, %v1189_v3  ;;  %v776_v6 = vcombine.low %v1187_v2, %v1189_v3  ;;  %v1197_v7 = vld [vmem:[%s281_s12 + $0x18] sm:$0xff]  ;;  %319 = vperm.xlu0 %861, %v293_v12   ;;  %329 = vperm.xlu1 %862, %v295_v13   ;;  %v304_v58 = vunpack.c.l.bf16 %v1187_v2  ;;  %v305_v61 = vunpack.c.h.bf16 %v1187_v2  ;;  %p924_p13 = scmp.ne.s32.totalorder %s1253_s17, %s923_s26  ;;  %p1327_p8 = scmp.ne.s32.totalorder %s1320_s28, 0 }
  0x57   : > { %v777_v8 = vcombine.high %v1191_v4, %v1197_v7  ;;  %v778_v11 = vcombine.low %v1191_v4, %v1197_v7  ;;  %v307_v10 = vunpack.c.h.bf16 %v1189_v3  ;;  %s1017_s21 = smov [#allocation7]  }
  0x58   : > { %760 = vmatprep.subr.bf16.mxu0 %v775_v5  ;;  %p925_p10 = pnand %p924_p13, %p1327_p8  ;;  %s927_s14 = sshll.u32 %s1017_s21, 4  ;;  %s928_s14 = int_to_ptr.vmem [resolvable:$false] %s927_s14 }
  0x59   : > { %762 = vmatpush1.bf16.msra.mxu0 %v776_v6  ;;  %v306_v6 = vunpack.c.l.bf16 %v1189_v3  ;;  %s929_s7 = scalar_lea.vmem %s928_s14, 1024  ;;  %p930_p2 = scmp.lt.s32.totalorder %s1253_s17, %s928_s14 }
  0x5a   : > { %764 = vmatprep.subr.bf16.mxu0 %v777_v8  ;;  %444 = vperm.xlu0 %861, %v296_v15   ;;  %p926_p11 = pneg %p925_p10  ;;  %p931_p3 = scmp.lt.s32.totalorder %s929_s7, %s923_s26 }
  0x5b   : > { %449 = vperm.xlu1 %862, %v297_v16   ;;  %v308_v16 = vunpack.c.l.bf16 %v1191_v4 }
  0x5c   : > { %p932_p5 = por %p931_p3, %p930_p2 }
  0x5d   : > { %766 = vmatpush1.bf16.msra.mxu0 %v778_v11 }
  0x5e   : > { %454 = vperm.xlu0 %861, %v298_v18   ;;  %p933_p6 = pnand %p932_p5, %p926_p11 }
  0x5f   : > { %459 = vperm.xlu1 %862, %v299_v19  }
  0x60   : > { %736 = vmatmul.mubr.msk.f32.vlgmr.msra.gmra.mrb[0].mxu0 %vm332_vm0, %v284_v14 }
  0x61   : > { %415 = vmatprep.mubr.f32.mxu0 %v1015_v0 }
  0x64   : > { %737 = vmatmul.mubr.msk.f32.gmra.mrb[2].mxu0 %vm332_vm0, %v285_v17 }
  0x65   : > { %421 = vmatprep.mubr.f32.mxu0 %v1015_v0 }
  0x68   : > { %738 = vmatmul.mubr.msk.f32.gmra.mrb[4].mxu0 %vm332_vm0, %v286_v20 }
  0x69   : > { %427 = vmatprep.mubr.f32.mxu0 %v1015_v0 }
  0x6c   : > { %739 = vmatmul.mubr.msk.f32.gmra.mrb[6].mxu0 %vm332_vm0, %v287_v21  ;;  %v309_v21 = vunpack.c.h.bf16 %v1191_v4 }
  0xd1   : > { %v315_v22 = vpop.permute.xlu0 %314  ;;  %v325_v31 = vpop.permute.xlu1 %324 }
  0xd5   : > { %v320_v26 = vpop.permute.xlu0 %319  ;;  %v330_v42 = vpop.permute.xlu1 %329 }
  0xd9   : > { %v445_v59 = vpop.permute.xlu0 %444 }
  0xda   : > { %v450_v8 = vpop.permute.xlu1 %449 }
  0xdd   : > { %v455_v17 = vpop.permute.xlu0 %454 }
 0x133   : > { %v411_v23 = vpop.f32.mrb[0].mxu0 }
 0x134   : > { %v413_v24 = vpop.f32.mrb[1].mxu0  ;;  %v412_v25 = vadd.f32 %v411_v23, %v315_v22 }
 0x135   : > { %v414_v27 = vadd.f32 %v413_v24, %v315_v22 }
 0x136   : > { %v434_v33 = vmax.f32 %v412_v25, 0.0 }
 0x137   : > { %v417_v28 = vpop.f32.mrb[2].mxu0  ;;  %v435_v35 = vmax.f32 %v414_v27, 0.0  ;;  %v310_v27 = vunpack.c.l.bf16 %v1197_v7 }
 0x138   : > { %v418_v29 = vadd.f32 %v417_v28, %v320_v26  ;;  %v419_v30 = vpop.f32.mrb[3].mxu0  ;;  %v460_v28 = vpop.permute.xlu1 %459 }
 0x139   : > { %v420_v32 = vadd.f32 %v419_v30, %v320_v26 }
 0x13a   : > { %v436_v34 = vmax.f32 %v418_v29, 0.0 }
 0x13b   : > { %v437_v36 = vmax.f32 %v420_v32, 0.0  ;;  %v423_v37 = vpop.f32.mrb[4].mxu0  ;;  %v311_v32 = vunpack.c.h.bf16 %v1197_v7 }
 0x13c   : > { %v425_v38 = vpop.f32.mrb[5].mxu0  ;;  %v769_v39 = vpack.c.bf16 %v436_v34, %v434_v33  ;;  %v424_v41 = vadd.f32 %v423_v37, %v325_v31 }
 0x13d   : > { %v767_v40 = vpack.c.bf16 %v437_v36, %v435_v35  ;;  %v426_v43 = vadd.f32 %v425_v38, %v325_v31 }
 0x13e   : > { %v438_v48 = vmax.f32 %v424_v41, 0.0 }
 0x13f   : > { %v429_v44 = vpop.f32.mrb[6].mxu0  ;;  %768 = vmatprep.subr.bf16.mxu1 %v767_v40  ;;  %v439_v50 = vmax.f32 %v426_v43, 0.0 }
 0x140   : > { %v430_v45 = vadd.f32 %v429_v44, %v330_v42  ;;  %v431_v46 = vpop.f32.mrb[7].mxu0  ;;  %770 = vmatpush1.bf16.msra.mxu1 %v769_v39 }
 0x141   : > { %v432_v47 = vadd.f32 %v431_v46, %v330_v42 }
 0x142   : > { %v440_v49 = vmax.f32 %v430_v45, 0.0 }
 0x143   : > { %v441_v51 = vmax.f32 %v432_v47, 0.0 }
 0x144   : > { %v773_v52 = vpack.c.bf16 %v440_v49, %v438_v48 }
 0x145   : > { %v771_v53 = vpack.c.bf16 %v441_v51, %v439_v50 }
 0x147   : > { %772 = vmatprep.subr.bf16.mxu1 %v771_v53 }
 0x148   : > { %774 = vmatpush1.bf16.msra.mxu1 %v773_v52 }
 0x14b   : > { %740 = vmatmul.mubr.msk.f32.vlgmr.msra.gmra.mrb[0].mxu1 %vm332_vm0, %v288_v54 }
 0x14c   : > { %544 = vmatprep.mubr.f32.mxu1 %v1015_v0 }
 0x14f   : > { %741 = vmatmul.mubr.msk.f32.gmra.mrb[2].mxu1 %vm332_vm0, %v289_v55 }
 0x150   : > { %550 = vmatprep.mubr.f32.mxu1 %v1015_v0 }
 0x153   : > { %742 = vmatmul.mubr.msk.f32.gmra.mrb[4].mxu1 %vm332_vm0, %v290_v56 }
 0x154   : > { %556 = vmatprep.mubr.f32.mxu1 %v1015_v0 }
 0x157   : > { %743 = vmatmul.mubr.msk.f32.gmra.mrb[6].mxu1 %vm332_vm0, %v291_v57 }
 0x21e   : > { %v540_v60 = vpop.f32.mrb[0].mxu1 }
 0x21f   : > { %v541_v62 = vadd.f32 %v540_v60, %v445_v59  ;;  %v542_v63 = vpop.f32.mrb[1].mxu1 }
 0x220   : > { %v543_v1 = vadd.f32 %v542_v63, %v445_v59 }
 0x221   : > { %v563_v5 = vadd.f32 %v541_v62, %v304_v58 }
 0x222   : > { %v564_v0 = vadd.f32 %v543_v1, %v305_v61  ;;  %v546_v9 = vpop.f32.mrb[2].mxu1 }
 0x223   : > { %v571_v11 = vmax.f32 %v563_v5, 0.0  ;;  %v547_v12 = vadd.f32 %v546_v9, %v450_v8  ;;  %v548_v13 = vpop.f32.mrb[3].mxu1 }
 0x224   : > { %v572_v14 = vmax.f32 %v564_v0, 0.0  ;;  %v549_v15 = vadd.f32 %v548_v13, %v450_v8 }
 0x225   : > { %v565_v2 = vadd.f32 %v547_v12, %v306_v6 }
 0x226   : > { %v754_v18 = vpack.c.bf16 %v572_v14, %v571_v11  ;;  %v566_v19 = vadd.f32 %v549_v15, %v307_v10  ;;  %v552_v20 = vpop.f32.mrb[4].mxu1 }
 0x227   : > { %v573_v22 = vmax.f32 %v565_v2, 0.0  ;;  %v553_v23 = vadd.f32 %v552_v20, %v455_v17  ;;  %v554_v24 = vpop.f32.mrb[5].mxu1 }
 0x228   : > { %603 = vst [vmem:[%s272_s16] sm:$0xff] %v754_v18  ;;  %v574_v3 = vmax.f32 %v566_v19, 0.0  ;;  %v555_v25 = vadd.f32 %v554_v24, %v455_v17 }
 0x229   : > { %v567_v26 = vadd.f32 %v553_v23, %v308_v16 }
 0x22a   : > { %v755_v29 = vpack.c.bf16 %v574_v3, %v573_v22  ;;  %v568_v30 = vadd.f32 %v555_v25, %v309_v21  ;;  %v558_v31 = vpop.f32.mrb[6].mxu1 }
 0x22b   : > { %v575_v33 = vmax.f32 %v567_v26, 0.0  ;;  %v559_v34 = vadd.f32 %v558_v31, %v460_v28  ;;  %v560_v4 = vpop.f32.mrb[7].mxu1 }
 0x22c   : > { %604 = vst [vmem:[%s272_s16 + $0x8] sm:$0xff] %v755_v29  ;;  %v576_v35 = vmax.f32 %v568_v30, 0.0  ;;  %v561_v36 = vadd.f32 %v560_v4, %v460_v28 }
 0x22d   : > { %v569_v37 = vadd.f32 %v559_v34, %v310_v27 }
 0x22e   : > { %v756_v38 = vpack.c.bf16 %v576_v35, %v575_v33  ;;  %v570_v39 = vadd.f32 %v561_v36, %v311_v32 }
 0x22f   : > { %v577_v40 = vmax.f32 %v569_v37, 0.0 }
 0x230   : > { %605 = vst [vmem:[%s272_s16 + $0x10] sm:$0xff] %v756_v38  ;;  %v578_v41 = vmax.f32 %v570_v39, 0.0 }
 0x232   : > { %v757_v7 = vpack.c.bf16 %v578_v41, %v577_v40 }
 0x234   : > { %606 = vst [vmem:[%s272_s16 + $0x18] sm:$0xff] %v757_v7 }
 0x235   : > { %936 = shalt.err (!%p933_p6)
}
 0x236   : > { %s937_s11 = scalar_lea.hbm %s1258_s29, 512  ;;  %s941_s12 = scalar_lea.hbm %s1313_s5, 1024 }
 0x237   : > { %p938_p7 = scmp.ne.s32.totalorder %s1258_s29, %s937_s11  ;;  %p942_p0 = scmp.lt.u32.totalorder %s1258_s29, %s1313_s5 }
 0x238   : > { %p943_p4 = scmp.lt.u32.totalorder %s941_s12, %s937_s11  ;;  %p945_p13 = scmp.lt.u32.totalorder %s937_s11, %s1258_s29 }
 0x239   : > { %p939_p9 = pnand %p938_p7, %p1327_p8 }
 0x23a   : > { %p944_p1 = por %p943_p4, %p942_p0 }
 0x23b   : > { %p940_p12 = pneg %p939_p9 }
 0x23c   : > { %p946_p10 = por %p945_p13, %p944_p1 }
 0x23e   : > { %p947_p11 = pnand %p946_p10, %p940_p12 }
 0x240   : > { %950 = shalt.err (!%p947_p11)
}
 0x241   : > { %s1018_s16 = smov 128   ;;  %s1019_s24 = smov 8  }
 0x242   : > { %787 = dma.vmem_to_hbm [thread:$0]  (%p1327_p8), %s1253_s17, 512, %s1258_s29, %s1262_s10, %s1018_s16, %s1018_s16, %s1019_s24  }
 0x243 PF: > { %p804_p2 = scmp.ge.s32.totalorder %s1009_s23, 2  ;;  %s638_s25 = sand.u32 1, %s989_s18  }
 0x244   : > { %p1328_p3 = scmp.ne.s32.totalorder %s1321_s30, 0  ;;  %s639_s27 = scalar_lea.sflag [#allocation4], %s638_s25 }
 0x246   : > { %p797_p5 = pnand %p804_p2, %p1328_p3 }
 0x248   : > { %984 = dma.done.wait (!%p797_p5), %s639_s27, 512  }
 0x249   : > { %986 = vsyncadd (!%p797_p5), %s639_s27, 4294966784  ;;  %s20_s23 = sadd.s32 1, %s1009_s23   ;;  %s1329_s28 = sld [smem:[#allocation11_spill]] }
 0x24a   : > { %p17_p6 = scmp.ge.s32.totalorder %s20_s23, 4   ;;  %s1330_s18 = smov %s993_s19 }
 0x24b   : > { %s1331_s19 = smov %s997_s20  ;;  %s1332_s20 = smov %s1103_s6 }
 0x24c   : > { %s1333_s21 = smov %s1005_s22  ;;  %19 = sbr.rel (!%p17_p6) target bundleno = 6 (0x6), region = 84 }
 0x24f   : > { %s1334_s22 = smov %s1329_s28 }
 0x253   :  { %644 = vsyncpa [#allocation3], 1 }
 0x254   :  { %646 = vsyncpa [#allocation3 + $0x1], 1 }
 0x255   :  { %647 = vsyncpa [#allocation6], 1 }
 0x256   :  { %648 = vsyncpa [#allocation4], 1 }
 0x257   :  { %650 = vsyncpa [#allocation4 + $0x1], 1 }

</bundles_post_ra>
